<compile_context>
chip_gen: v7x
topology: tpu7x:2x2x1
jax: 0.10.0
libtpu: 0.0.40
codegen_flags: <defaults>
</compile_context>

<pallas_src>
import functools

import jax
import jax.numpy as jnp
import numpy as np
from jax.experimental import pallas as pl
from jax.experimental.pallas import tpu as pltpu


def inverted_residual_kernel(x_ref, we_ref, be_ref, wd_ref, bd_ref,
                             wp_ref, bp_ref, m_ref, o_ref, *, W, mm_dtype):
    x = x_ref[...]                                   # (Cin_p, L) f32, lane-dense
    L = x.shape[1]

    # ---- expansion: 1x1 conv (BN scale pre-folded) + bias + ReLU  (MXU) ----
    e = jnp.dot(we_ref[...].astype(mm_dtype), x.astype(mm_dtype),
                preferred_element_type=jnp.float32)  # (Cexp, L)
    e = jnp.maximum(e + be_ref[...], 0.0)

    # ---- depthwise 3x3, stride 1, pad 1 ----
    # Precomputed per-lane masks (1.0 inside the image, 0.0 on the zero-pad /
    # wrap positions). m_ref[k] is (1, L).
    m_wlo = m_ref[0]     # w >= 1      (left  neighbour valid)
    m_whi = m_ref[1]     # w <= W - 2  (right neighbour valid)
    m_hlo = m_ref[2]     # h >= 1      (upper row valid)
    m_hhi = m_ref[3]     # h <= H - 2  (lower row valid)

    # Two w-shifted bases, masked once each (XLU roll + one VPU mul).
    bL = pltpu.roll(e, 1, axis=1) * m_wlo            # e[h, w-1]
    bR = pltpu.roll(e, L - 1, axis=1) * m_whi        # e[h, w+1]

    # Per-row weighted combos; tap k = (dy+1)*3 + (dx+1), wd_ref[k] is (Cexp, 1).
    row_u = wd_ref[0] * bL + wd_ref[1] * e + wd_ref[2] * bR   # dy = -1 taps
    row_c = wd_ref[3] * bL + wd_ref[4] * e + wd_ref[5] * bR   # dy =  0 taps
    row_d = wd_ref[6] * bL + wd_ref[7] * e + wd_ref[8] * bR   # dy = +1 taps

    # Accumulate: start from the broadcast bias, roll the off-row combos by
    # +/-W and apply a single h-boundary mask to each.
    acc = bd_ref[...] + row_c
    acc = acc + pltpu.roll(row_u, W, axis=1) * m_hlo          # row h-1
    acc = acc + pltpu.roll(row_d, L - W, axis=1) * m_hhi      # row h+1
    d = jnp.maximum(acc, 0.0)                                 # (Cexp, L)

    # ---- projection: 1x1 conv (BN scale pre-folded) + bias  (MXU) ----
    p = jnp.dot(wp_ref[...].astype(mm_dtype), d.astype(mm_dtype),
                preferred_element_type=jnp.float32)           # (Cout_p, L)

    # ---- residual add (Cout == Cin, stride == 1; padded rows stay zero) ----
    o_ref[...] = (p + bp_ref[...] + x).astype(o_ref.dtype)


def _images_per_step(N, HW, max_lanes=8192):
    """Images flattened onto the lane axis per grid step.

    Caps the per-step lane width (VMEM budget, v7x-safe) and keeps at least
    two grid steps when N >= 2 so both v7x TensorCores are used.
    """
    cap = max(1, max_lanes // HW)
    if N >= 2:
        cap = min(cap, N // 2)
    nb = 1
    for cand in range(1, cap + 1):
        if N % cand == 0:
            nb = cand
    return nb


def inverted_residual(x_nchw, params, *, images_per_step=None,
                      matmul_dtype=jnp.float32):
    """x_nchw: (N, Cin, H, W) float32 -> (N, Cout, H, W) float32."""
    we, se, be, wd, sd, bd, wp, sp, bp = params
    N, Cin, H, W = x_nchw.shape
    HW = H * W
    Cexp = we.shape[1]
    Cout = wp.shape[1]
    assert Cout == Cin, "residual add requires out_planes == in_planes"
    # TODO(synk): stride=2 / residual=False variants of the PyTorch module are
    # not implemented (this kernel covers the stride=1 residual forward).

    SUB = 8
    Cin_p = ((Cin + SUB - 1) // SUB) * SUB
    Cout_p = ((Cout + SUB - 1) // SUB) * SUB

    # Fold BN scales into conv weights at trace time; transpose to (out, in).
    we_f = (we * se).T                                           # (Cexp, Cin)
    wd_f = (wd * sd.reshape(1, 1, Cexp)).reshape(9, Cexp, 1)     # (9, Cexp, 1)
    wp_f = (wp * sp).T                                           # (Cout, Cexp)
    be_f = be.reshape(Cexp, 1)
    bd_f = bd.reshape(Cexp, 1)
    bp_f = bp.reshape(Cout, 1)

    # Zero-pad channel dims to full sublane groups.
    we_f = jnp.pad(we_f, ((0, 0), (0, Cin_p - Cin)))             # (Cexp, Cin_p)
    wp_f = jnp.pad(wp_f, ((0, Cout_p - Cout), (0, 0)))           # (Cout_p, Cexp)
    bp_f = jnp.pad(bp_f, ((0, Cout_p - Cout), (0, 0)))           # (Cout_p, 1)

    # Batching: nb images flattened onto the lane axis per grid step.
    nb = images_per_step if images_per_step is not None else _images_per_step(N, HW)
    assert N % nb == 0
    G = N // nb
    L = nb * HW

    # NCHW -> channels on sublanes, batch*spatial on lanes.
    x = x_nchw.reshape(N, Cin, HW)
    x = jnp.pad(x, ((0, 0), (0, Cin_p - Cin), (0, 0)))
    x_flat = jnp.transpose(x, (1, 0, 2)).reshape(Cin_p, N * HW)  # (Cin_p, N*HW)

    # Precompute the four boundary masks for one step's lane block (per-image
    # periodic, so one block serves every grid step).
    col = np.arange(HW)
    h_idx = col // W
    w_idx = col % W
    m = np.stack([w_idx >= 1, w_idx <= W - 2,
                  h_idx >= 1, h_idx <= H - 2]).astype(np.float32)  # (4, HW)
    masks = jnp.asarray(np.tile(m, (1, nb)).reshape(4, 1, L))

    kernel = functools.partial(inverted_residual_kernel, W=W,
                               mm_dtype=matmul_dtype)

    out_flat = pl.pallas_call(
        kernel,
        out_shape=jax.ShapeDtypeStruct((Cout_p, N * HW), x_nchw.dtype),
        grid=(G,),
        in_specs=[
            pl.BlockSpec((Cin_p, L), lambda g: (0, g)),
            pl.BlockSpec((Cexp, Cin_p), lambda g: (0, 0)),
            pl.BlockSpec((Cexp, 1), lambda g: (0, 0)),
            pl.BlockSpec((9, Cexp, 1), lambda g: (0, 0, 0)),
            pl.BlockSpec((Cexp, 1), lambda g: (0, 0)),
            pl.BlockSpec((Cout_p, Cexp), lambda g: (0, 0)),
            pl.BlockSpec((Cout_p, 1), lambda g: (0, 0)),
            pl.BlockSpec((4, 1, L), lambda g: (0, 0, 0)),
        ],
        out_specs=pl.BlockSpec((Cout_p, L), lambda g: (0, g)),
        compiler_params=pltpu.CompilerParams(
            dimension_semantics=("parallel",)),
    )(x_flat, we_f, be_f, wd_f, bd_f, wp_f, bp_f, masks)

    out = out_flat.reshape(Cout_p, N, HW)[:Cout]                 # drop pad rows
    out = jnp.transpose(out, (1, 0, 2)).reshape(N, Cout, H, W)
    return out


def make_params(key, cin, cout, t):
    """Deterministic synthetic weights; BN folded to (scale, bias) (eval mode)."""
    cexp = cin * t
    eps = 1e-5
    ks = jax.random.split(key, 16)

    we = 0.1 * jax.random.normal(ks[0], (cin, cexp), jnp.float32)    # 1x1 expand
    wd = 0.1 * jax.random.normal(ks[1], (3, 3, cexp), jnp.float32)   # 3x3 depthwise
    wp = 0.1 * jax.random.normal(ks[2], (cexp, cout), jnp.float32)   # 1x1 project

    def bn_fold(kg, kb, km, kv, c):
        gamma = 1.0 + 0.1 * jax.random.normal(kg, (c,), jnp.float32)
        beta = 0.1 * jax.random.normal(kb, (c,), jnp.float32)
        mean = 0.1 * jax.random.normal(km, (c,), jnp.float32)
        var = jnp.abs(jax.random.normal(kv, (c,), jnp.float32)) + 0.5
        scale = gamma / jnp.sqrt(var + eps)
        bias = beta - mean * scale
        return scale.reshape(1, c), bias.reshape(1, c)

    se, be = bn_fold(ks[3], ks[4], ks[5], ks[6], cexp)
    sd, bd = bn_fold(ks[7], ks[8], ks[9], ks[10], cexp)
    sp, bp = bn_fold(ks[11], ks[12], ks[13], ks[14], cout)
    return we, se, be, wd, sd, bd, wp, sp, bp


def reference(x_nchw, params):
    """Pure-JAX reference (lax convs) for correctness checking."""
    we, se, be, wd, sd, bd, wp, sp, bp = params
    x = jnp.transpose(x_nchw, (0, 2, 3, 1))
    cexp = we.shape[1]
    dn = ("NHWC", "HWIO", "NHWC")
    e = jax.lax.conv_general_dilated(x, we.reshape(1, 1, *we.shape), (1, 1),
                                     "VALID", dimension_numbers=dn)
    e = jnp.maximum(e * se.reshape(1, 1, 1, -1) + be.reshape(1, 1, 1, -1), 0.0)
    d = jax.lax.conv_general_dilated(e, wd.reshape(3, 3, 1, cexp), (1, 1),
                                     ((1, 1), (1, 1)), dimension_numbers=dn,
                                     feature_group_count=cexp)
    d = jnp.maximum(d * sd.reshape(1, 1, 1, -1) + bd.reshape(1, 1, 1, -1), 0.0)
    p = jax.lax.conv_general_dilated(d, wp.reshape(1, 1, *wp.shape), (1, 1),
                                     "VALID", dimension_numbers=dn)
    p = p * sp.reshape(1, 1, 1, -1) + bp.reshape(1, 1, 1, -1)
    return jnp.transpose(p + x, (0, 3, 1, 2))


if __name__ == "__main__":
    # InvertedResidual(in_planes=4, out_planes=4, stride=1, t=6, residual=True)
    N, Cin, H, W = 2, 4, 16, 16
    t = 6
    Cout = Cin  # required for the residual add, as in the PyTorch usage

    key = jax.random.PRNGKey(0)
    kx, kp = jax.random.split(key)
    x = jax.random.normal(kx, (N, Cin, H, W), jnp.float32)
    params = make_params(kp, Cin, Cout, t)

    ref = jax.block_until_ready(reference(x, params))

    # Default split: >=2 parallel grid steps (keeps both v7x TensorCores busy).
    out = jax.block_until_ready(inverted_residual(x, params))
    np.testing.assert_allclose(np.asarray(out), np.asarray(ref),
                               rtol=2e-4, atol=2e-4)

    # Fully flattened variant: both images share one lane slab in one grid
    # step; verifies the boundary masks also block cross-image roll wrap.
    out_flat = jax.block_until_ready(
        inverted_residual(x, params, images_per_step=N))
    np.testing.assert_allclose(np.asarray(out_flat), np.asarray(ref),
                               rtol=2e-4, atol=2e-4)

    print("KERNEL_OK")
</pallas_src>

<mosaic_0001>
module attributes {stable_mosaic.version = 11 : i64} {
  func.func @inverted_residual_kernel(%arg0: i32, %arg1: memref<8x256xf32, #tpu.memory_space<vmem>>, %arg2: memref<24x8xf32, #tpu.memory_space<vmem>>, %arg3: memref<24x1xf32, #tpu.memory_space<vmem>>, %arg4: memref<9x24x1xf32, #tpu.memory_space<vmem>>, %arg5: memref<24x1xf32, #tpu.memory_space<vmem>>, %arg6: memref<8x24xf32, #tpu.memory_space<vmem>>, %arg7: memref<8x1xf32, #tpu.memory_space<vmem>>, %arg8: memref<4x1x256xf32, #tpu.memory_space<vmem>>, %arg9: memref<8x256xf32, #tpu.memory_space<vmem>>) attributes {dimension_semantics = [#tpu.dimension_semantics<parallel>], iteration_bounds = array<i64: 2>, scalar_prefetch = 0 : i64, scratch_operands = 0 : i64, tpu.core_type = #tpu.core_type<tc>, window_params = [{transform_indices = @transform_0, window_bounds = array<i64: 8, 256>}, {pipeline_mode = #tpu.pipeline_mode<synchronous>, transform_indices = @transform_1, window_bounds = array<i64: 24, 8>}, {pipeline_mode = #tpu.pipeline_mode<synchronous>, transform_indices = @transform_2, window_bounds = array<i64: 24, 1>}, {pipeline_mode = #tpu.pipeline_mode<synchronous>, transform_indices = @transform_3, window_bounds = array<i64: 9, 24, 1>}, {pipeline_mode = #tpu.pipeline_mode<synchronous>, transform_indices = @transform_4, window_bounds = array<i64: 24, 1>}, {pipeline_mode = #tpu.pipeline_mode<synchronous>, transform_indices = @transform_5, window_bounds = array<i64: 8, 24>}, {pipeline_mode = #tpu.pipeline_mode<synchronous>, transform_indices = @transform_6, window_bounds = array<i64: 8, 1>}, {pipeline_mode = #tpu.pipeline_mode<synchronous>, transform_indices = @transform_7, window_bounds = array<i64: 4, 1, 256>}, {transform_indices = @transform_8, window_bounds = array<i64: 8, 256>}]} {
    %c0 = arith.constant 0 : index
    %c0_0 = arith.constant 0 : index
    %0 = vector.load %arg1[%c0, %c0_0] : memref<8x256xf32, #tpu.memory_space<vmem>>, vector<8x256xf32>
    %c0_1 = arith.constant 0 : index
    %c0_2 = arith.constant 0 : index
    %1 = vector.load %arg2[%c0_1, %c0_2] : memref<24x8xf32, #tpu.memory_space<vmem>>, vector<24x8xf32>
    %cst = arith.constant dense<0.000000e+00> : vector<24x256xf32>
    %2 = tpu.matmul %1, %0, %cst {dimension_numbers = #tpu.dot_dimension_numbers<[1], [0], [0], [1], [0, 0, 1, 1], [], []>} : vector<24x8xf32>, vector<8x256xf32>, vector<24x256xf32> -> vector<24x256xf32>
    %c0_3 = arith.constant 0 : index
    %c0_4 = arith.constant 0 : index
    %3 = vector.load %arg3[%c0_3, %c0_4] : memref<24x1xf32, #tpu.memory_space<vmem>>, vector<24x1xf32>
    %4 = vector.broadcast %3 : vector<24x1xf32> to vector<24x256xf32>
    %5 = arith.addf %2, %4 : vector<24x256xf32>
    %cst_5 = arith.constant 0.000000e+00 : f32
    %6 = vector.broadcast %cst_5 : f32 to vector<24x256xf32>
    %7 = arith.maximumf %5, %6 : vector<24x256xf32>
    %c0_6 = arith.constant 0 : index
    %c0_7 = arith.constant 0 : index
    %c0_8 = arith.constant 0 : index
    %8 = vector.load %arg8[%c0_6, %c0_7, %c0_8] : memref<4x1x256xf32, #tpu.memory_space<vmem>>, vector<1x1x256xf32>
    %9 = vector.shape_cast %8 : vector<1x1x256xf32> to vector<1x256xf32>
    %c1 = arith.constant 1 : index
    %c0_9 = arith.constant 0 : index
    %c0_10 = arith.constant 0 : index
    %10 = vector.load %arg8[%c1, %c0_9, %c0_10] : memref<4x1x256xf32, #tpu.memory_space<vmem>>, vector<1x1x256xf32>
    %11 = vector.shape_cast %10 : vector<1x1x256xf32> to vector<1x256xf32>
    %c2 = arith.constant 2 : index
    %c0_11 = arith.constant 0 : index
    %c0_12 = arith.constant 0 : index
    %12 = vector.load %arg8[%c2, %c0_11, %c0_12] : memref<4x1x256xf32, #tpu.memory_space<vmem>>, vector<1x1x256xf32>
    %13 = vector.shape_cast %12 : vector<1x1x256xf32> to vector<1x256xf32>
    %c3 = arith.constant 3 : index
    %c0_13 = arith.constant 0 : index
    %c0_14 = arith.constant 0 : index
    %14 = vector.load %arg8[%c3, %c0_13, %c0_14] : memref<4x1x256xf32, #tpu.memory_space<vmem>>, vector<1x1x256xf32>
    %15 = vector.shape_cast %14 : vector<1x1x256xf32> to vector<1x256xf32>
    %c1_i32 = arith.constant 1 : i32
    %16 = tpu.dynamic_rotate %7 by %c1_i32 dim 1 : vector<24x256xf32>, i32 -> vector<24x256xf32>
    %17 = vector.broadcast %9 : vector<1x256xf32> to vector<24x256xf32>
    %18 = arith.mulf %16, %17 : vector<24x256xf32>
    %c255_i32 = arith.constant 255 : i32
    %19 = tpu.dynamic_rotate %7 by %c255_i32 dim 1 : vector<24x256xf32>, i32 -> vector<24x256xf32>
    %20 = vector.broadcast %11 : vector<1x256xf32> to vector<24x256xf32>
    %21 = arith.mulf %19, %20 : vector<24x256xf32>
    %c0_15 = arith.constant 0 : index
    %c0_16 = arith.constant 0 : index
    %c0_17 = arith.constant 0 : index
    %22 = vector.load %arg4[%c0_15, %c0_16, %c0_17] : memref<9x24x1xf32, #tpu.memory_space<vmem>>, vector<1x24x1xf32>
    %23 = vector.shape_cast %22 : vector<1x24x1xf32> to vector<24x1xf32>
    %24 = vector.broadcast %23 : vector<24x1xf32> to vector<24x256xf32>
    %25 = arith.mulf %24, %18 : vector<24x256xf32>
    %c1_18 = arith.constant 1 : index
    %c0_19 = arith.constant 0 : index
    %c0_20 = arith.constant 0 : index
    %26 = vector.load %arg4[%c1_18, %c0_19, %c0_20] : memref<9x24x1xf32, #tpu.memory_space<vmem>>, vector<1x24x1xf32>
    %27 = vector.shape_cast %26 : vector<1x24x1xf32> to vector<24x1xf32>
    %28 = vector.broadcast %27 : vector<24x1xf32> to vector<24x256xf32>
    %29 = arith.mulf %28, %7 : vector<24x256xf32>
    %30 = arith.addf %25, %29 : vector<24x256xf32>
    %c2_21 = arith.constant 2 : index
    %c0_22 = arith.constant 0 : index
    %c0_23 = arith.constant 0 : index
    %31 = vector.load %arg4[%c2_21, %c0_22, %c0_23] : memref<9x24x1xf32, #tpu.memory_space<vmem>>, vector<1x24x1xf32>
    %32 = vector.shape_cast %31 : vector<1x24x1xf32> to vector<24x1xf32>
    %33 = vector.broadcast %32 : vector<24x1xf32> to vector<24x256xf32>
    %34 = arith.mulf %33, %21 : vector<24x256xf32>
    %35 = arith.addf %30, %34 : vector<24x256xf32>
    %c3_24 = arith.constant 3 : index
    %c0_25 = arith.constant 0 : index
    %c0_26 = arith.constant 0 : index
    %36 = vector.load %arg4[%c3_24, %c0_25, %c0_26] : memref<9x24x1xf32, #tpu.memory_space<vmem>>, vector<1x24x1xf32>
    %37 = vector.shape_cast %36 : vector<1x24x1xf32> to vector<24x1xf32>
    %38 = vector.broadcast %37 : vector<24x1xf32> to vector<24x256xf32>
    %39 = arith.mulf %38, %18 : vector<24x256xf32>
    %c4 = arith.constant 4 : index
    %c0_27 = arith.constant 0 : index
    %c0_28 = arith.constant 0 : index
    %40 = vector.load %arg4[%c4, %c0_27, %c0_28] : memref<9x24x1xf32, #tpu.memory_space<vmem>>, vector<1x24x1xf32>
    %41 = vector.shape_cast %40 : vector<1x24x1xf32> to vector<24x1xf32>
    %42 = vector.broadcast %41 : vector<24x1xf32> to vector<24x256xf32>
    %43 = arith.mulf %42, %7 : vector<24x256xf32>
    %44 = arith.addf %39, %43 : vector<24x256xf32>
    %c5 = arith.constant 5 : index
    %c0_29 = arith.constant 0 : index
    %c0_30 = arith.constant 0 : index
    %45 = vector.load %arg4[%c5, %c0_29, %c0_30] : memref<9x24x1xf32, #tpu.memory_space<vmem>>, vector<1x24x1xf32>
    %46 = vector.shape_cast %45 : vector<1x24x1xf32> to vector<24x1xf32>
    %47 = vector.broadcast %46 : vector<24x1xf32> to vector<24x256xf32>
    %48 = arith.mulf %47, %21 : vector<24x256xf32>
    %49 = arith.addf %44, %48 : vector<24x256xf32>
    %c6 = arith.constant 6 : index
    %c0_31 = arith.constant 0 : index
    %c0_32 = arith.constant 0 : index
    %50 = vector.load %arg4[%c6, %c0_31, %c0_32] : memref<9x24x1xf32, #tpu.memory_space<vmem>>, vector<1x24x1xf32>
    %51 = vector.shape_cast %50 : vector<1x24x1xf32> to vector<24x1xf32>
    %52 = vector.broadcast %51 : vector<24x1xf32> to vector<24x256xf32>
    %53 = arith.mulf %52, %18 : vector<24x256xf32>
    %c7 = arith.constant 7 : index
    %c0_33 = arith.constant 0 : index
    %c0_34 = arith.constant 0 : index
    %54 = vector.load %arg4[%c7, %c0_33, %c0_34] : memref<9x24x1xf32, #tpu.memory_space<vmem>>, vector<1x24x1xf32>
    %55 = vector.shape_cast %54 : vector<1x24x1xf32> to vector<24x1xf32>
    %56 = vector.broadcast %55 : vector<24x1xf32> to vector<24x256xf32>
    %57 = arith.mulf %56, %7 : vector<24x256xf32>
    %58 = arith.addf %53, %57 : vector<24x256xf32>
    %c8 = arith.constant 8 : index
    %c0_35 = arith.constant 0 : index
    %c0_36 = arith.constant 0 : index
    %59 = vector.load %arg4[%c8, %c0_35, %c0_36] : memref<9x24x1xf32, #tpu.memory_space<vmem>>, vector<1x24x1xf32>
    %60 = vector.shape_cast %59 : vector<1x24x1xf32> to vector<24x1xf32>
    %61 = vector.broadcast %60 : vector<24x1xf32> to vector<24x256xf32>
    %62 = arith.mulf %61, %21 : vector<24x256xf32>
    %63 = arith.addf %58, %62 : vector<24x256xf32>
    %c0_37 = arith.constant 0 : index
    %c0_38 = arith.constant 0 : index
    %64 = vector.load %arg5[%c0_37, %c0_38] : memref<24x1xf32, #tpu.memory_space<vmem>>, vector<24x1xf32>
    %65 = vector.broadcast %64 : vector<24x1xf32> to vector<24x256xf32>
    %66 = arith.addf %65, %49 : vector<24x256xf32>
    %c16_i32 = arith.constant 16 : i32
    %67 = tpu.dynamic_rotate %35 by %c16_i32 dim 1 : vector<24x256xf32>, i32 -> vector<24x256xf32>
    %68 = vector.broadcast %13 : vector<1x256xf32> to vector<24x256xf32>
    %69 = arith.mulf %67, %68 : vector<24x256xf32>
    %70 = arith.addf %66, %69 : vector<24x256xf32>
    %c240_i32 = arith.constant 240 : i32
    %71 = tpu.dynamic_rotate %63 by %c240_i32 dim 1 : vector<24x256xf32>, i32 -> vector<24x256xf32>
    %72 = vector.broadcast %15 : vector<1x256xf32> to vector<24x256xf32>
    %73 = arith.mulf %71, %72 : vector<24x256xf32>
    %74 = arith.addf %70, %73 : vector<24x256xf32>
    %cst_39 = arith.constant 0.000000e+00 : f32
    %75 = vector.broadcast %cst_39 : f32 to vector<24x256xf32>
    %76 = arith.maximumf %74, %75 : vector<24x256xf32>
    %c0_40 = arith.constant 0 : index
    %c0_41 = arith.constant 0 : index
    %77 = vector.load %arg6[%c0_40, %c0_41] : memref<8x24xf32, #tpu.memory_space<vmem>>, vector<8x24xf32>
    %cst_42 = arith.constant dense<0.000000e+00> : vector<8x256xf32>
    %78 = tpu.matmul %77, %76, %cst_42 {dimension_numbers = #tpu.dot_dimension_numbers<[1], [0], [0], [1], [0, 0, 1, 1], [], []>} : vector<8x24xf32>, vector<24x256xf32>, vector<8x256xf32> -> vector<8x256xf32>
    %c0_43 = arith.constant 0 : index
    %c0_44 = arith.constant 0 : index
    %79 = vector.load %arg7[%c0_43, %c0_44] : memref<8x1xf32, #tpu.memory_space<vmem>>, vector<8x1xf32>
    %80 = vector.broadcast %79 : vector<8x1xf32> to vector<8x256xf32>
    %81 = arith.addf %78, %80 : vector<8x256xf32>
    %82 = arith.addf %81, %0 : vector<8x256xf32>
    %c0_45 = arith.constant 0 : index
    %c0_46 = arith.constant 0 : index
    %83 = vector.load %arg9[%c0_45, %c0_46] : memref<8x256xf32, #tpu.memory_space<vmem>>, vector<8x256xf32>
    tpu.vector_store %arg9[%c0_45, %c0_46], %82 {strides = array<i32>} : memref<8x256xf32, #tpu.memory_space<vmem>>, vector<8x256xf32>,
    return
  }
  func.func @transform_0(%arg0: i32) -> (i32, i32) {
    %c0_i32 = arith.constant 0 : i32
    %c0_i32_0 = arith.constant 0 : i32
    return %c0_i32, %arg0 : i32, i32
  }
  func.func @transform_1(%arg0: i32) -> (i32, i32) {
    %c0_i32 = arith.constant 0 : i32
    %c0_i32_0 = arith.constant 0 : i32
    %c0_i32_1 = arith.constant 0 : i32
    return %c0_i32, %c0_i32_0 : i32, i32
  }
  func.func @transform_2(%arg0: i32) -> (i32, i32) {
    %c0_i32 = arith.constant 0 : i32
    %c0_i32_0 = arith.constant 0 : i32
    %c0_i32_1 = arith.constant 0 : i32
    return %c0_i32, %c0_i32_0 : i32, i32
  }
  func.func @transform_3(%arg0: i32) -> (i32, i32, i32) {
    %c0_i32 = arith.constant 0 : i32
    %c0_i32_0 = arith.constant 0 : i32
    %c0_i32_1 = arith.constant 0 : i32
    %c0_i32_2 = arith.constant 0 : i32
    return %c0_i32, %c0_i32_0, %c0_i32_1 : i32, i32, i32
  }
  func.func @transform_4(%arg0: i32) -> (i32, i32) {
    %c0_i32 = arith.constant 0 : i32
    %c0_i32_0 = arith.constant 0 : i32
    %c0_i32_1 = arith.constant 0 : i32
    return %c0_i32, %c0_i32_0 : i32, i32
  }
  func.func @transform_5(%arg0: i32) -> (i32, i32) {
    %c0_i32 = arith.constant 0 : i32
    %c0_i32_0 = arith.constant 0 : i32
    %c0_i32_1 = arith.constant 0 : i32
    return %c0_i32, %c0_i32_0 : i32, i32
  }
  func.func @transform_6(%arg0: i32) -> (i32, i32) {
    %c0_i32 = arith.constant 0 : i32
    %c0_i32_0 = arith.constant 0 : i32
    %c0_i32_1 = arith.constant 0 : i32
    return %c0_i32, %c0_i32_0 : i32, i32
  }
  func.func @transform_7(%arg0: i32) -> (i32, i32, i32) {
    %c0_i32 = arith.constant 0 : i32
    %c0_i32_0 = arith.constant 0 : i32
    %c0_i32_1 = arith.constant 0 : i32
    %c0_i32_2 = arith.constant 0 : i32
    return %c0_i32, %c0_i32_0, %c0_i32_1 : i32, i32, i32
  }
  func.func @transform_8(%arg0: i32) -> (i32, i32) {
    %c0_i32 = arith.constant 0 : i32
    %c0_i32_0 = arith.constant 0 : i32
    return %c0_i32, %arg0 : i32, i32
  }
}

</mosaic_0001>

<bundles_post_ra>
// kernel: tpu_custom_call.1
= control target key start
LH: loop header
LB: loop body
LE: loop exit
PB: predicated region body
PF: predicated region fallthrough
CT: control target
= control target key end

     0   :  { %13 = vsyncpa [#allocation3], 0  ;;  %s1741_s0 = inlined_call_operand.vmem [shape: f32[8,512], index: 0, kind: input, shape index: {}]   ;;  %s1742_s1 = inlined_call_operand.vmem [shape: f32[24,8], index: 1, kind: input, shape index: {}]   ;;  %s1743_s2 = inlined_call_operand.vmem [shape: f32[24,1], index: 2, kind: input, shape index: {}]   ;;  %s1744_s3 = inlined_call_operand.vmem [shape: f32[9,24,1], index: 3, kind: input, shape index: {}]   ;;  %s1745_s4 = inlined_call_operand.vmem [shape: f32[24,1], index: 4, kind: input, shape index: {}]   ;;  %s1746_s5 = inlined_call_operand.vmem [shape: f32[8,24], index: 5, kind: input, shape index: {}]   ;;  %s1747_s6 = inlined_call_operand.vmem [shape: f32[8,1], index: 6, kind: input, shape index: {}]   ;;  %s1748_s7 = inlined_call_operand.vmem [shape: f32[4,1,256], index: 7, kind: input, shape index: {}]   ;;  %s1749_s8 = inlined_call_operand.hbm [shape: f32[8,512], index: 8, kind: output, shape index: {}]  }
   0x1   :  { %15 = vsyncpa [#allocation3 + $0x1], 0  ;;  %s1255_s27 = smov 0   ;;  %s1257_s28 = smov 0  }
   0x2   :  { %s1259_s29 = smov 0   ;;  %s1261_s30 = smov 0  }
   0x3 LB: > { %s1276_s9 = sadd.s32 4294967295, %s1201_s30   ;;  %s1044_s10 = sadd.s32 4294967294, %s1201_s30   ;;  %s1201_s30 = sphi %s1261_s30, %s1755_s30   ;;  %s1197_s29 = sphi %s1259_s29, %s1754_s29   ;;  %s1193_s28 = sphi %s1257_s28, %s1753_s28   ;;  %s1189_s27 = sphi %s1255_s27, %s1752_s27  }
   0x4   : > { %s1280_s11 = sadd.s32 1, %s1201_s30   ;;  %s201_s12 = sadd.s32 1, %s1197_s29 }
   0x5   : > { %s198_s13 = ssub.s32 %s1201_s30, %s1280_s11  ;;  %p211_p0 = scmp.ne.s32.totalorder %s1197_s29, %s1193_s28 }
   0x6   : > { %p199_p1 = scmp.eq.s32.totalorder %s198_s13, 0  ;;  %p212_p2 = scmp.eq.s32.totalorder %s1276_s9, 1 }
   0x7   : > { %p217_p3 = scmp.ne.s32.totalorder %s1193_s28, %s1189_s27  ;;  %p218_p4 = scmp.eq.s32.totalorder %s1044_s10, 1 }
   0x8   : > { %s1291_s14 = scalar_select %p199_p1, %s1197_s29, %s201_s12  }
   0x9   : > { %p1293_p5 = por %p212_p2, %p211_p0  ;;  %p1297_p6 = por %p218_p4, %p217_p3 }
   0xa   : > { %p1047_p7 = scmp.ge.s32.totalorder %s1201_s30, 1  ;;  %p266_p8 = scmp.lt.s32.totalorder %s1201_s30, 3 }
   0xc   : > { %p267_p9 = pnand %p1047_p7, %p266_p8 }
   0xd   : > { %s1049_s17 = sshll.u32 (!%p267_p9), %s1276_s9, 1  ;;  %v1203_v0 = vmov (!%p267_p9), 0.0   ;;  %v312_v1 = vld [vmem:[%s1743_s2] sm:$0xff] (!%p267_p9)  ;;  %v1204_v2 = vmov (!%p267_p9), 0   ;;  %v314_v3 = vld [vmem:[%s1743_s2 + $0x10] sm:$0xff] (!%p267_p9)  ;;  %v313_v4 = vld [vmem:[%s1743_s2 + $0x8] sm:$0xff] (!%p267_p9) }
   0xe   : > { %270 = sbr.rel (%p267_p9) target bundleno = 756 (0x2f4), region = 52  ;;  %p301_p10 = scmp.lt.s32.totalorder (!%p267_p9), %s1049_s17, 3  ;;  %404 = vmatprep.mubr.f32.mxu0 (!%p267_p9), %v1203_v0  ;;  %959 = vmatprep.mubr.f32.mxu1 (!%p267_p9), %v1203_v0  ;;  %v510_v5 = vld [vmem:[%s1744_s3] sm:$0xff] (!%p267_p9)  ;;  %vm330_vm0 = vcmask (!%p267_p9), 64512   ;;  %v511_v9 = vld [vmem:[%s1744_s3 + $0x8] sm:$0xff] (!%p267_p9)  ;;  %v1057_v10 = vld [vmem:[%s1744_s3 + $0x18] sm:$0xff] (!%p267_p9) }
   0xf   : > { %1137 = vset.pattern.permute.xlu0 (!%p267_p9), %v1204_v2  ;;  %1138 = vset.pattern.permute.xlu1 (!%p267_p9), %v1204_v2  ;;  %v309_v8 = vld [vmem:[%s1742_s1] sm:$0xff] (!%p267_p9)  ;;  %v310_v11 = vld [vmem:[%s1742_s1 + $0x8] sm:$0xff] (!%p267_p9)  ;;  %v1060_v13 = vld [vmem:[%s1744_s3 + $0x30] sm:$0xff] (!%p267_p9)  ;;  %s1205_s19 = smov (!%p267_p9), 1   ;;  %s1207_s22 = smov (!%p267_p9), 16   ;;  %vm891_vm5 = vcmask (!%p267_p9), 195584  }
  0x10   : > { %317 = vperm.xlu0 (!%p267_p9), %1137, %v312_v1   ;;  %327 = vperm.xlu1 (!%p267_p9), %1138, %v314_v3   ;;  %v1058_v12 = vld [vmem:[%s1744_s3 + $0x20] sm:$0xff] (!%p267_p9)  ;;  %v311_v14 = vld [vmem:[%s1742_s1 + $0x10] sm:$0xff] (!%p267_p9)  ;;  %v1061_v15 = vld [vmem:[%s1744_s3 + $0x38] sm:$0xff] (!%p267_p9)  ;;  %s1208_s23 = smov (!%p267_p9), 112   ;;  %s1087_s21 = sshll.u32 (!%p267_p9), %s1276_s9, 8 }
  0x11   : > { %v1072_v16 = vld [vmem:[%s1744_s3 + $0x90] sm:$0xff] (!%p267_p9)  ;;  %v1073_v17 = vld [vmem:[%s1744_s3 + $0x98] sm:$0xff] (!%p267_p9)  ;;  %v1075_v18 = vld [vmem:[%s1744_s3 + $0xa8] sm:$0xff] (!%p267_p9)  ;;  %s1699_s26 = scalar_lea.hbm (!%p267_p9), %s1749_s8, %s1087_s21  ;;  %s1209_s12 = smov (!%p267_p9), [#allocation2]  }
  0x12   : > { %v1076_v19 = vld [vmem:[%s1744_s3 + $0xb0] sm:$0xff] (!%p267_p9)  ;;  %v1078_v20 = vld [vmem:[%s1744_s3 + $0xc0] sm:$0xff] (!%p267_p9)  ;;  %v1079_v21 = vld [vmem:[%s1744_s3 + $0xc8] sm:$0xff] (!%p267_p9) }
  0x13   : > { %v512_v22 = vld [vmem:[%s1744_s3 + $0x10] sm:$0xff] (!%p267_p9)  ;;  %v1059_v23 = vld [vmem:[%s1744_s3 + $0x28] sm:$0xff] (!%p267_p9)  ;;  %v1062_v24 = vld [vmem:[%s1744_s3 + $0x40] sm:$0xff] (!%p267_p9) }
  0x14   : > { %322 = vperm.xlu0 (!%p267_p9), %1137, %v313_v4   ;;  %515 = vperm.xlu1 (!%p267_p9), %1138, %v510_v5   ;;  %v1074_v25 = vld [vmem:[%s1744_s3 + $0xa0] sm:$0xff] (!%p267_p9)  ;;  %v1077_v26 = vld [vmem:[%s1744_s3 + $0xb8] sm:$0xff] (!%p267_p9)  ;;  %v1080_v27 = vld [vmem:[%s1744_s3 + $0xd0] sm:$0xff] (!%p267_p9) }
  0x15   : > { %s1757_s17 = smov (!%p301_p10, %s1049_s17), 3  ;;  %v1063_v49 = vld [vmem:[%s1744_s3 + $0x48] sm:$0xff]  ;;  %v1064_v50 = vld [vmem:[%s1744_s3 + $0x50] sm:$0xff]  ;;  %v1066_v51 = vld [vmem:[%s1744_s3 + $0x60] sm:$0xff] }
  0x16   : > { %s1050_s24 = sshll.u32 %s1757_s17, 3  ;;  %s1206_s17 = smov 127   ;;  %v1067_v52 = vld [vmem:[%s1744_s3 + $0x68] sm:$0xff]  ;;  %v1069_v53 = vld [vmem:[%s1744_s3 + $0x78] sm:$0xff]  ;;  %v1070_v54 = vld [vmem:[%s1744_s3 + $0x80] sm:$0xff] }
  0x17   : > { %s304_s13 = scalar_lea.vmem %s1741_s0, %s1050_s24  ;;  %v1065_v55 = vld [vmem:[%s1744_s3 + $0x58] sm:$0xff]  ;;  %v1068_v56 = vld [vmem:[%s1744_s3 + $0x70] sm:$0xff]  ;;  %v770_v57 = vld [vmem:[%s1745_s4] sm:$0xff] }
  0x18   : > { %v1319_v6 = vld [vmem:[%s304_s13 + $0x8] sm:$0xff]  ;;  %v1321_v7 = vld [vmem:[%s304_s13] sm:$0xff]  ;;  %520 = vperm.xlu0 %1137, %v511_v9   ;;  %540 = vperm.xlu1 %1138, %v1057_v10   ;;  %v772_v60 = vld [vmem:[%s1745_s4 + $0x10] sm:$0xff]  ;;  %s1143_s13 = sshll.u32 %s1209_s12, 4  ;;  %s1144_s13 = int_to_ptr.vmem [resolvable:$false] %s1143_s13 }
  0x19   : > { %340 = vmatprep.subr.mxu0 %v1319_v6  ;;  %v771_v58 = vld [vmem:[%s1745_s4 + $0x8] sm:$0xff]  ;;  %s1145_s18 = scalar_lea.vmem %s1144_s13, 512 }
  0x1a   : > { %341 = vmatpush1.msra.mxu0 %v1321_v7  ;;  %v1071_v59 = vld [vmem:[%s1744_s3 + $0x88] sm:$0xff] }
  0x1b   : > { %1051 = vmatmul.mubr.msk.f32.vlgmr.msra.gmra.mrb[0].mxu0 %vm330_vm0, %v309_v8 }
  0x1c   : > { %410 = vmatprep.mubr.f32.mxu0 %v1203_v0  ;;  %545 = vperm.xlu0 %1137, %v1058_v12  }
  0x1d   : > { %571 = vperm.xlu1 %1138, %v1060_v13  }
  0x1f   : > { %1052 = vmatmul.mubr.msk.f32.gmra.mrb[2].mxu0 %vm330_vm0, %v310_v11 }
  0x20   : > { %416 = vmatprep.mubr.f32.mxu0 %v1203_v0  ;;  %576 = vperm.xlu0 %1137, %v1061_v15   ;;  %v448_v15 = vlaneseq }
  0x21   : > { %689 = vperm.xlu1 %1138, %v1072_v16  }
  0x23   : > { %1053 = vmatmul.mubr.msk.f32.gmra.mrb[4].mxu0 %vm330_vm0, %v311_v14 }
  0x24   : > { %694 = vperm.xlu0 %1137, %v1073_v17   ;;  %v459_v17 = vshrl.u32 %v448_v15, 7 }
  0x25   : > { %714 = vperm.xlu1 %1138, %v1075_v18  }
  0x28   : > { %719 = vperm.xlu0 %1137, %v1076_v19  }
  0x29   : > { %745 = vperm.xlu1 %1138, %v1078_v20   ;;  %v1478_v20 = vand.u32 127, %v448_v15 }
  0x2b   : > { %vm450_vm1 = vcmp.lt.s32.totalorder %v1478_v20, 1  ;;  %vm486_vm2 = vcmp.lt.s32.totalorder %v1478_v20, 127  ;;  %vm806_vm3 = vcmp.lt.s32.totalorder %v1478_v20, 16  ;;  %vm848_vm4 = vcmp.lt.s32.totalorder %v1478_v20, 112 }
  0x2c   : > { %750 = vperm.xlu0 %1137, %v1079_v21   ;;  %v1480_v21 = vsub.s32 0, %v459_v17 }
  0x2d   : > { %525 = vperm.xlu1 %1138, %v512_v22   ;;  %v429_v22 = vld [vmem:[%s1748_s7] sm:$0x3] }
  0x30   : > { %550 = vperm.xlu0 %1137, %v1059_v23  }
  0x31   : > { %581 = vperm.xlu1 %1138, %v1062_v24  }
  0x34   : > { %699 = vperm.xlu0 %1137, %v1074_v25   ;;  %v1485_v25 = vsub.s32 1, %v459_v17 }
  0x35   : > { %724 = vperm.xlu1 %1138, %v1077_v26   ;;  %v461_v26 = vrot.slane %v429_v22, %v1480_v21 }
  0x38   : > { %755 = vperm.xlu0 %1137, %v1080_v27   ;;  %v1054_v27 = vld [vmem:[%s1748_s7 + $0x2] sm:$0x3] }
  0x8f   : > { %v318_v28 = vpop.permute.xlu0 %317  ;;  %v328_v43 = vpop.permute.xlu1 %327 }
  0x93   : > { %v323_v33 = vpop.permute.xlu0 %322  ;;  %v516_v61 = vpop.permute.xlu1 %515 }
  0x97   : > { %v1448_v62 = vpop.permute.xlu0 %520  ;;  %v541_v63 = vpop.permute.xlu1 %540 }
  0x9b   : > { %v1450_v0 = vpop.permute.xlu0 %545 }
  0x9c   : > { %v572_v1 = vpop.permute.xlu1 %571 }
  0x9f   : > { %v1452_v2 = vpop.permute.xlu0 %576 }
  0xa0   : > { %v1454_v3 = vpop.permute.xlu1 %689 }
  0xa3   : > { %v1456_v4 = vpop.permute.xlu0 %694 }
  0xa4   : > { %v1458_v5 = vpop.permute.xlu1 %714 }
  0xa7   : > { %v1460_v8 = vpop.permute.xlu0 %719 }
  0xa8   : > { %v1462_v9 = vpop.permute.xlu1 %745 }
  0xab   : > { %v1464_v10 = vpop.permute.xlu0 %750 }
  0xac   : > { %v1466_v11 = vpop.permute.xlu1 %525 }
  0xaf   : > { %v1468_v12 = vpop.permute.xlu0 %550 }
  0xb0   : > { %v1470_v13 = vpop.permute.xlu1 %581 }
  0xb3   : > { %v1472_v14 = vpop.permute.xlu0 %699 }
  0xb4   : > { %v1474_v16 = vpop.permute.xlu1 %724 }
  0xb7   : > { %v1476_v18 = vpop.permute.xlu0 %755 }
  0xee   : > { %v406_v29 = vpop.f32.mrb[0].mxu0 }
  0xef   : > { %v407_v30 = vadd.f32 %v406_v29, %v318_v28  ;;  %v408_v31 = vpop.f32.mrb[1].mxu0  ;;  %v1493_v29 = vrot.slane %v429_v22, %v1485_v25 }
  0xf0   : > { %v409_v37 = vadd.f32 %v408_v31, %v318_v28 }
  0xf1   : > { %v1388_v32 = vmax.f32 %v407_v30, 0.0 }
  0xf2   : > { %v412_v34 = vpop.f32.mrb[2].mxu0  ;;  %v1395_v41 = vmax.f32 %v409_v37, 0.0 }
  0xf3   : > { %v413_v35 = vadd.f32 %v412_v34, %v323_v33  ;;  %v414_v36 = vpop.f32.mrb[3].mxu0  ;;  %436 = vrot.lane.b32.xlu1 %v1388_v32, %s1205_s19 }
  0xf4   : > { %v415_v42 = vadd.f32 %v414_v36, %v323_v33  ;;  %v1504_v36 = vrot.slane %v1054_v27, %v1485_v25 }
  0xf5   : > { %v1391_v38 = vmax.f32 %v413_v35, 0.0  ;;  %v497_v35 = vrot.slane %v1054_v27, %v1480_v21 }
  0xf6   : > { %v418_v39 = vpop.f32.mrb[4].mxu0  ;;  %v1399_v44 = vmax.f32 %v415_v42, 0.0 }
  0xf7   : > { %v420_v40 = vpop.f32.mrb[5].mxu0  ;;  %438 = vrot.lane.b32.xlu0 %v1391_v38, %s1205_s19  ;;  %474 = vrot.lane.b32.xlu1 %v1388_v32, %s1206_s17  ;;  %v419_v46 = vadd.f32 %v418_v39, %v328_v43  ;;  %v555_v22 = vmul.f32 %v1450_v0, %v1391_v38 }
  0xf8   : > { %v421_v45 = vadd.f32 %v420_v40, %v328_v43 }
  0xf9   : > { %v1407_v48 = vmax.f32 %v419_v46, 0.0 }
  0xfa   : > { %v1403_v47 = vmax.f32 %v421_v45, 0.0 }
  0xfb   : > { %476 = vrot.lane.b32.xlu0 %v1391_v38, %s1206_s17  ;;  %442 = vrot.lane.b32.xlu1 %v1395_v41, %s1205_s19 }
  0xff   : > { %444 = vrot.lane.b32.xlu0 %v1399_v44, %s1205_s19  ;;  %480 = vrot.lane.b32.xlu1 %v1395_v41, %s1206_s17 }
 0x103   : > { %482 = vrot.lane.b32.xlu0 %v1399_v44, %s1206_s17  ;;  %446 = vrot.lane.b32.xlu1 %v1403_v47, %s1205_s19 }
 0x107   : > { %440 = vrot.lane.b32.xlu0 %v1407_v48, %s1205_s19  ;;  %478 = vrot.lane.b32.xlu1 %v1407_v48, %s1206_s17 }
 0x10b   : > { %484 = vrot.lane.b32.xlu0 %v1403_v47, %s1206_s17  ;;  %602 = vperm.xlu1 %1138, %v1063_v49   ;;  %s297_s17 = sand.u32 1, %s1193_s28  }
 0x10c   : > { %s1048_s20 = sshll.u32 %s297_s17, 4  ;;  %s971_s9 = scalar_lea.sflag [#allocation3], %s297_s17 }
 0x10f   : > { %607 = vperm.xlu0 %1137, %v1064_v50   ;;  %627 = vperm.xlu1 %1138, %v1066_v51  }
 0x113   : > { %632 = vperm.xlu0 %1137, %v1067_v52   ;;  %658 = vperm.xlu1 %1138, %v1069_v53   ;;  %v553_v53 = vmul.f32 %v541_v63, %v1388_v32 }
 0x117   : > { %663 = vperm.xlu0 %1137, %v1070_v54   ;;  %612 = vperm.xlu1 %1138, %v1065_v55  }
 0x11b   : > { %637 = vperm.xlu0 %1137, %v1068_v56   ;;  %775 = vperm.xlu1 %1138, %v770_v57  }
 0x11f   : > { %780 = vperm.xlu0 %1137, %v771_v58   ;;  %668 = vperm.xlu1 %1138, %v1071_v59  }
 0x123   : > { %785 = vperm.xlu0 %1137, %v772_v60  }
 0x165   : > { %v437_v19 = vpop.permute.xlu1 %436 }
 0x169   : > { %v439_v23 = vpop.permute.xlu0 %438  ;;  %v475_v24 = vpop.permute.xlu1 %474 }
 0x16d   : > { %v477_v28 = vpop.permute.xlu0 %476  ;;  %v443_v30 = vpop.permute.xlu1 %442 }
 0x16e   : > { %v451_v31 = vsel %vm450_vm1, %v437_v19, %v443_v30  ;;  %v454_v33 = vsel %vm450_vm1, %v443_v30, %v437_v19 }
 0x16f   : > { %v1499_v34 = vmul.f32 %v461_v26, %v454_v33  ;;  %v1507_v37 = vmul.f32 %v1493_v29, %v451_v31 }
 0x171   : > { %v528_v39 = vmul.f32 %v516_v61, %v1499_v34  ;;  %v445_v40 = vpop.permute.xlu0 %444  ;;  %v481_v42 = vpop.permute.xlu1 %480  ;;  %v529_v54 = vmul.f32 %v516_v61, %v1507_v37 }
 0x172   : > { %v452_v43 = vsel %vm450_vm1, %v439_v23, %v445_v40  ;;  %v455_v45 = vsel %vm450_vm1, %v445_v40, %v439_v23  ;;  %v487_v46 = vsel %vm486_vm2, %v475_v24, %v481_v42  ;;  %v490_v49 = vsel %vm486_vm2, %v481_v42, %v475_v24 }
 0x173   : > { %v1518_v50 = vmul.f32 %v461_v26, %v455_v45  ;;  %v1520_v51 = vmul.f32 %v497_v35, %v487_v46  ;;  %v1523_v52 = vmul.f32 %v1504_v36, %v490_v49  ;;  %v1528_v55 = vmul.f32 %v1493_v29, %v452_v43 }
 0x174   : > { %v559_v15 = vadd.f32 %v553_v53, %v528_v39  ;;  %v554_v24 = vmul.f32 %v541_v63, %v1395_v41  ;;  %v702_v39 = vmul.f32 %v1454_v3, %v1499_v34  ;;  %v727_v45 = vmul.f32 %v1458_v5, %v1388_v32 }
 0x175   : > { %v530_v56 = vmul.f32 %v1448_v62, %v1518_v50  ;;  %v483_v57 = vpop.permute.xlu0 %482  ;;  %v447_v58 = vpop.permute.xlu1 %446  ;;  %v584_v17 = vmul.f32 %v572_v1, %v1520_v51  ;;  %v585_v27 = vmul.f32 %v572_v1, %v1523_v52  ;;  %v531_v30 = vmul.f32 %v1448_v62, %v1528_v55 }
 0x176   : > { %v488_v59 = vsel %vm486_vm2, %v477_v28, %v483_v57  ;;  %v491_v60 = vsel %vm486_vm2, %v483_v57, %v477_v28  ;;  %v560_v40 = vadd.f32 %v554_v24, %v529_v54  ;;  %v556_v62 = vmul.f32 %v1450_v0, %v1399_v44 }
 0x177   : > { %v1537_v19 = vmul.f32 %v497_v35, %v488_v59  ;;  %v1540_v61 = vmul.f32 %v1504_v36, %v491_v60  ;;  %v590_v23 = vadd.f32 %v584_v17, %v559_v15  ;;  %v561_v31 = vadd.f32 %v555_v22, %v530_v56 }
 0x178   : > { %v591_v46 = vadd.f32 %v585_v27, %v560_v40  ;;  %v758_v49 = vmul.f32 %v1462_v9, %v1520_v51  ;;  %v703_v53 = vmul.f32 %v1454_v3, %v1507_v37  ;;  %v704_v54 = vmul.f32 %v1456_v4, %v1518_v50 }
 0x179   : > { %v441_v28 = vpop.permute.xlu0 %440  ;;  %v586_v33 = vmul.f32 %v1452_v2, %v1537_v19  ;;  %794 = vrot.lane.b32.xlu1 %v590_v23, %s1207_s22  ;;  %v479_v1 = vpop.permute.xlu1 %478  ;;  %v587_v43 = vmul.f32 %v1452_v2, %v1540_v61  ;;  %v562_v0 = vadd.f32 %v556_v62, %v531_v30  ;;  %v733_v60 = vadd.f32 %v727_v45, %v702_v39 }
 0x17a   : > { %v456_v63 = vsel %vm450_vm1, %v447_v58, %v441_v28  ;;  %v453_v2 = vsel %vm450_vm1, %v441_v28, %v447_v58  ;;  %v728_v3 = vmul.f32 %v1458_v5, %v1395_v41  ;;  %v729_v17 = vmul.f32 %v1460_v8, %v1391_v38 }
 0x17b   : > { %v592_v42 = vadd.f32 %v586_v33, %v561_v31  ;;  %v1570_v57 = vmul.f32 %v461_v26, %v456_v63  ;;  %v593_v15 = vadd.f32 %v587_v43, %v562_v0  ;;  %v760_v22 = vmul.f32 %v1464_v10, %v1537_v19 }
 0x17c   : > { %v764_v23 = vadd.f32 %v758_v49, %v733_v60  ;;  %v759_v24 = vmul.f32 %v1462_v9, %v1523_v52  ;;  %v705_v27 = vmul.f32 %v1456_v4, %v1528_v55  ;;  %v1590_v5 = vmul.f32 %v1493_v29, %v453_v2 }
 0x17d   : > { %v485_v56 = vpop.permute.xlu0 %484  ;;  %796 = vrot.lane.b32.xlu0 %v592_v42, %s1207_s22  ;;  %800 = vrot.lane.b32.xlu1 %v591_v46, %s1207_s22  ;;  %v735_v30 = vadd.f32 %v729_v17, %v704_v54  ;;  %v532_v28 = vmul.f32 %v1466_v11, %v1570_v57  ;;  %v730_v4 = vmul.f32 %v1460_v8, %v1399_v44 }
 0x17e   : > { %v489_v59 = vsel %vm486_vm2, %v479_v1, %v485_v56  ;;  %v492_v26 = vsel %vm486_vm2, %v485_v56, %v479_v1  ;;  %v761_v29 = vmul.f32 %v1464_v10, %v1540_v61  ;;  %v557_v39 = vmul.f32 %v1468_v12, %v1407_v48 }
 0x17f   : > { %v1583_v58 = vmul.f32 %v497_v35, %v489_v59  ;;  %v734_v35 = vadd.f32 %v728_v3, %v703_v53  ;;  %v1597_v31 = vmul.f32 %v1504_v36, %v492_v26  ;;  %v766_v9 = vadd.f32 %v760_v22, %v735_v30 }
 0x180   : > { %v533_v63 = vmul.f32 %v1466_v11, %v1590_v5  ;;  %v736_v36 = vadd.f32 %v730_v4, %v705_v27  ;;  %v706_v42 = vmul.f32 %v1472_v14, %v1570_v57  ;;  %v563_v8 = vadd.f32 %v557_v39, %v532_v28 }
 0x181   : > { %802 = vrot.lane.b32.xlu0 %v593_v15, %s1207_s22  ;;  %836 = vrot.lane.b32.xlu1 %v764_v23, %s1208_s23  ;;  %v765_v33 = vadd.f32 %v759_v24, %v734_v35  ;;  %v588_v40 = vmul.f32 %v1470_v13, %v1583_v58  ;;  %v558_v1 = vmul.f32 %v1468_v12, %v1403_v47 }
 0x182   : > { %v767_v10 = vadd.f32 %v761_v29, %v736_v36  ;;  %v589_v62 = vmul.f32 %v1470_v13, %v1597_v31  ;;  %v731_v43 = vmul.f32 %v1474_v16, %v1407_v48  ;;  %v762_v45 = vmul.f32 %v1476_v18, %v1583_v58 }
 0x183   : > { %v594_v11 = vadd.f32 %v588_v40, %v563_v8  ;;  %v707_v46 = vmul.f32 %v1472_v14, %v1590_v5  ;;  %v564_v49 = vadd.f32 %v558_v1, %v533_v63  ;;  %v732_v13 = vmul.f32 %v1474_v16, %v1403_v47  ;;  %v885_v16 = vld [vmem:[%s1747_s6] sm:$0xff] }
 0x184   : > { %v737_v12 = vadd.f32 %v731_v43, %v706_v42  ;;  %v763_v56 = vmul.f32 %v1476_v18, %v1597_v31 }
 0x185   : > { %838 = vrot.lane.b32.xlu0 %v766_v9, %s1208_s23  ;;  %842 = vrot.lane.b32.xlu1 %v765_v33, %s1208_s23  ;;  %v595_v54 = vadd.f32 %v589_v62, %v564_v49  ;;  %v738_v2 = vadd.f32 %v732_v13, %v707_v46 }
 0x186   : > { %v768_v0 = vadd.f32 %v762_v45, %v737_v12 }
 0x187   : > { %v769_v15 = vadd.f32 %v763_v56, %v738_v2 }
 0x189   : > { %844 = vrot.lane.b32.xlu0 %v767_v10, %s1208_s23  ;;  %798 = vrot.lane.b32.xlu1 %v594_v11, %s1207_s22 }
 0x18a   : > { %v603_v53 = vpop.permute.xlu1 %602 }
 0x18b   : > { %v615_v17 = vmul.f32 %v603_v53, %v1499_v34  ;;  %v616_v18 = vmul.f32 %v603_v53, %v1507_v37 }
 0x18d   : > { %804 = vrot.lane.b32.xlu0 %v595_v54, %s1207_s22  ;;  %840 = vrot.lane.b32.xlu1 %v768_v0, %s1208_s23  ;;  %s299_s22 = scalar_lea.vmem [#allocation2], %s1048_s20 }
 0x18e   : > { %v608_v14 = vpop.permute.xlu0 %607  ;;  %v628_v59 = vpop.permute.xlu1 %627 }
 0x18f   : > { %v640_v60 = vmul.f32 %v628_v59, %v1388_v32  ;;  %v641_v3 = vmul.f32 %v628_v59, %v1395_v41  ;;  %v617_v28 = vmul.f32 %v608_v14, %v1518_v50  ;;  %v618_v34 = vmul.f32 %v608_v14, %v1528_v55 }
 0x191   : > { %846 = vrot.lane.b32.xlu0 %v769_v15, %s1208_s23  ;;  %v646_v22 = vadd.f32 %v640_v60, %v615_v17  ;;  %v647_v26 = vadd.f32 %v641_v3, %v616_v18  ;;  %888 = vperm.xlu1 %1138, %v885_v16   ;;  %s985_s23 = sshll.u32 %s299_s22, 4  ;;  %s1701_s23 = int_to_ptr.vmem [resolvable:$true] %s985_s23 }
 0x192   : > { %v633_v23 = vpop.permute.xlu0 %632  ;;  %v659_v24 = vpop.permute.xlu1 %658  ;;  %s1139_s10 = scalar_lea.vmem %s1701_s23, 256  ;;  %p1146_p0 = scmp.lt.s32.totalorder %s1701_s23, %s1144_s13 }
 0x193   : > { %v642_v32 = vmul.f32 %v633_v23, %v1391_v38  ;;  %v643_v41 = vmul.f32 %v633_v23, %v1399_v44  ;;  %v671_v27 = vmul.f32 %v659_v24, %v1520_v51  ;;  %v672_v30 = vmul.f32 %v659_v24, %v1523_v52  ;;  %p1140_p11 = scmp.ne.s32.totalorder %s1701_s23, %s1139_s10  ;;  %p1147_p1 = scmp.lt.s32.totalorder %s1145_s18, %s1139_s10 }
 0x195   : > { %v677_v37 = vadd.f32 %v671_v27, %v646_v22  ;;  %v678_v35 = vadd.f32 %v672_v30, %v647_v26  ;;  %v648_v29 = vadd.f32 %v642_v32, %v617_v28  ;;  %v649_v33 = vadd.f32 %v643_v41, %v618_v34  ;;  %p1141_p12 = pnand %p1140_p11, %p1293_p5  ;;  %p1148_p2 = por %p1147_p1, %p1146_p0 }
 0x196   : > { %v664_v9 = vpop.permute.xlu0 %663  ;;  %v613_v4 = vpop.permute.xlu1 %612 }
 0x197   : > { %v673_v39 = vmul.f32 %v664_v9, %v1537_v19  ;;  %v674_v38 = vmul.f32 %v664_v9, %v1540_v61  ;;  %v619_v55 = vmul.f32 %v613_v4, %v1570_v57  ;;  %v620_v36 = vmul.f32 %v613_v4, %v1590_v5  ;;  %p1142_p13 = pneg %p1141_p12 }
 0x199   : > { %v679_v40 = vadd.f32 %v673_v39, %v648_v29  ;;  %v680_v44 = vadd.f32 %v674_v38, %v649_v33  ;;  %p1149_p3 = pnand %p1148_p2, %p1142_p13 }
 0x19a   : > { %v638_v63 = vpop.permute.xlu0 %637  ;;  %v776_v51 = vpop.permute.xlu1 %775 }
 0x19b   : > { %v644_v52 = vmul.f32 %v638_v63, %v1407_v48  ;;  %v645_v50 = vmul.f32 %v638_v63, %v1403_v47  ;;  %v1055_v47 = vld [vmem:[%s1748_s7 + $0x4] sm:$0x3]  ;;  %v788_v60 = vadd.f32 %v776_v51, %v677_v37  ;;  %v789_v3 = vadd.f32 %v776_v51, %v678_v35 }
 0x19c   : > { %v817_v57 = vrot.slane %v1055_v47, %v1480_v21  ;;  %v821_v5 = vrot.slane %v1055_v47, %v1485_v25 }
 0x19d   : > { %v650_v8 = vadd.f32 %v644_v52, %v619_v55  ;;  %v651_v10 = vadd.f32 %v645_v50, %v620_v36 }
 0x19e   : > { %v669_v42 = vpop.permute.xlu1 %668  ;;  %v781_v43 = vpop.permute.xlu0 %780 }
 0x19f   : > { %v675_v1 = vmul.f32 %v669_v42, %v1583_v58  ;;  %v676_v19 = vmul.f32 %v669_v42, %v1597_v31  ;;  %v1056_v58 = vld [vmem:[%s1748_s7 + $0x6] sm:$0x3]  ;;  %v790_v24 = vadd.f32 %v781_v43, %v679_v40  ;;  %v791_v32 = vadd.f32 %v781_v43, %v680_v44 }
 0x1a0   : > { %v859_v13 = vrot.slane %v1056_v58, %v1480_v21  ;;  %v863_v54 = vrot.slane %v1056_v58, %v1485_v25 }
 0x1a1   : > { %v681_v61 = vadd.f32 %v675_v1, %v650_v8  ;;  %v682_v62 = vadd.f32 %v676_v19, %v651_v10 }
 0x1a2   : > { %v786_v11 = vpop.permute.xlu0 %785 }
 0x1a3   : > { %v792_v42 = vadd.f32 %v786_v11, %v681_v61  ;;  %v793_v8 = vadd.f32 %v786_v11, %v682_v62 }
 0x1eb   : > { %v795_v45 = vpop.permute.xlu1 %794 }
 0x1ef   : > { %v797_v46 = vpop.permute.xlu0 %796  ;;  %v801_v48 = vpop.permute.xlu1 %800 }
 0x1f0   : > { %v807_v31 = vsel %vm806_vm3, %v795_v45, %v801_v48  ;;  %v810_v49 = vsel %vm806_vm3, %v801_v48, %v795_v45 }
 0x1f1   : > { %v824_v56 = vmul.f32 %v817_v57, %v810_v49  ;;  %v825_v0 = vmul.f32 %v821_v5, %v807_v31  ;;  %v884_v31 = vld [vmem:[%s1746_s5] sm:$0xff] }
 0x1f3   : > { %v803_v53 = vpop.permute.xlu0 %802  ;;  %v837_v12 = vpop.permute.xlu1 %836  ;;  %v830_v25 = vadd.f32 %v824_v56, %v788_v60  ;;  %v831_v23 = vadd.f32 %v825_v0, %v789_v3 }
 0x1f4   : > { %v808_v2 = vsel %vm806_vm3, %v797_v46, %v803_v53  ;;  %v811_v14 = vsel %vm806_vm3, %v803_v53, %v797_v46 }
 0x1f5   : > { %v826_v16 = vmul.f32 %v817_v57, %v811_v14  ;;  %v827_v17 = vmul.f32 %v821_v5, %v808_v2 }
 0x1f7   : > { %v839_v59 = vpop.permute.xlu0 %838  ;;  %v843_v15 = vpop.permute.xlu1 %842  ;;  %v832_v37 = vadd.f32 %v826_v16, %v790_v24  ;;  %v833_v29 = vadd.f32 %v827_v17, %v791_v32 }
 0x1f8   : > { %v849_v18 = vsel %vm848_vm4, %v837_v12, %v843_v15  ;;  %v852_v21 = vsel %vm848_vm4, %v843_v15, %v837_v12 }
 0x1f9   : > { %v866_v22 = vmul.f32 %v859_v13, %v849_v18  ;;  %v867_v26 = vmul.f32 %v863_v54, %v852_v21 }
 0x1fb   : > { %v845_v41 = vpop.permute.xlu0 %844  ;;  %v873_v28 = vadd.f32 %v867_v26, %v831_v23  ;;  %v872_v34 = vadd.f32 %v866_v22, %v830_v25  ;;  %v799_v4 = vpop.permute.xlu1 %798 }
 0x1fc   : > { %v850_v27 = vsel %vm848_vm4, %v839_v59, %v845_v41  ;;  %v853_v30 = vsel %vm848_vm4, %v845_v41, %v839_v59 }
 0x1fd   : > { %v868_v35 = vmul.f32 %v859_v13, %v850_v27  ;;  %v869_v9 = vmul.f32 %v863_v54, %v853_v30  ;;  %v879_v63 = vmax.f32 %v873_v28, 0.0  ;;  %v878_v51 = vmax.f32 %v872_v34, 0.0 }
 0x1ff   : > { %v805_v33 = vpop.permute.xlu0 %804  ;;  %v875_v39 = vadd.f32 %v869_v9, %v833_v29  ;;  %v874_v38 = vadd.f32 %v868_v35, %v832_v37  ;;  %v841_v10 = vpop.permute.xlu1 %840 }
 0x200   : > { %v809_v40 = vsel %vm806_vm3, %v799_v4, %v805_v33  ;;  %v812_v44 = vsel %vm806_vm3, %v805_v33, %v799_v4 }
 0x201   : > { %v828_v52 = vmul.f32 %v817_v57, %v812_v44  ;;  %v829_v50 = vmul.f32 %v821_v5, %v809_v40  ;;  %v881_v55 = vmax.f32 %v875_v39, 0.0  ;;  %v880_v36 = vmax.f32 %v874_v38, 0.0 }
 0x203   : > { %v847_v1 = vpop.permute.xlu0 %846  ;;  %v1088_v19 = vpack.c.bf16 %v881_v55, %v879_v63  ;;  %v1090_v43 = vpack.c.bf16 %v880_v36, %v878_v51  ;;  %v834_v47 = vadd.f32 %v828_v52, %v792_v42  ;;  %v835_v48 = vadd.f32 %v829_v50, %v793_v8 }
 0x204   : > { %v851_v45 = vsel %vm848_vm4, %v841_v10, %v847_v1  ;;  %v854_v46 = vsel %vm848_vm4, %v847_v1, %v841_v10 }
 0x205   : > { %v870_v58 = vmul.f32 %v859_v13, %v851_v45  ;;  %v871_v57 = vmul.f32 %v863_v54, %v854_v46  ;;  %1089 = vmatprep.subr.bf16.mxu1 %v1088_v19 }
 0x206   : > { %1091 = vmatpush1.bf16.msra.mxu1 %v1090_v43 }
 0x207   : > { %v877_v61 = vadd.f32 %v871_v57, %v835_v48  ;;  %v876_v62 = vadd.f32 %v870_v58, %v834_v47 }
 0x209   : > { %v883_v11 = vmax.f32 %v877_v61, 0.0  ;;  %v882_v5 = vmax.f32 %v876_v62, 0.0 }
 0x20b   : > { %899 = vmatprep.subr.mxu1 %v883_v11 }
 0x20c   : > { %900 = vmatpush1.msra.mxu1 %v882_v5 }
 0x20d   : > { %1081 = vmatmul.mubr.msk.f32.vlgmr.msra.gmra.mrb[0].mxu1 %vm891_vm5, %v884_v31 }
 0x210   : > { %v889_v20 = vpop.permute.xlu1 %888 }
 0x2e0   : > { %v961_v49 = vpop.f32.mrb[0].mxu1 }
 0x2e1   : > { %v962_v53 = vadd.f32 %v961_v49, %v889_v20  ;;  %v963_v12 = vpop.f32.mrb[1].mxu1 }
 0x2e2   : > { %v964_v13 = vadd.f32 %v963_v12, %v889_v20 }
 0x2e3   : > { %v966_v54 = vadd.f32 %v962_v53, %v1321_v7 }
 0x2e4   : > { %v967_v56 = vadd.f32 %v964_v13, %v1319_v6 }
 0x2e5   : > { %968 = vst [vmem:[%s299_s22] sm:$0xff] %v966_v54 }
 0x2e6   : > { %969 = vst [vmem:[%s299_s22 + $0x8] sm:$0xff] %v967_v56 }
 0x2e7   : > { %1152 = shalt.err (!%p1149_p3)
}
 0x2e8   : > { %s1153_s19 = scalar_lea.hbm %s1699_s26, 256  ;;  %s1157_s21 = scalar_lea.hbm %s1749_s8, 512 }
 0x2e9   : > { %p1154_p4 = scmp.ne.s32.totalorder %s1699_s26, %s1153_s19  ;;  %p1158_p9 = scmp.lt.u32.totalorder %s1699_s26, %s1749_s8 }
 0x2ea   : > { %p1159_p10 = scmp.lt.u32.totalorder %s1157_s21, %s1153_s19  ;;  %p1161_p12 = scmp.lt.u32.totalorder %s1153_s19, %s1699_s26 }
 0x2eb   : > { %p1155_p7 = pnand %p1154_p4, %p1293_p5 }
 0x2ec   : > { %p1160_p11 = por %p1159_p10, %p1158_p9 }
 0x2ed   : > { %p1156_p8 = pneg %p1155_p7 }
 0x2ee   : > { %p1162_p13 = por %p1161_p12, %p1160_p11 }
 0x2f0   : > { %p1163_p0 = pnand %p1162_p13, %p1156_p8 }
 0x2f2   : > { %1166 = shalt.err (!%p1163_p0)
}
 0x2f3   : > { %1092 = dma.vmem_to_hbm [thread:$0]  (%p1293_p5), %s1701_s23, 256, %s1699_s26, %s971_s9  }
 0x2f4 PF: > { %p1098_p1 = scmp.ge.s32.totalorder %s1201_s30, 2  ;;  %s997_s25 = sand.u32 1, %s1189_s27  }
 0x2f5   : > { %s998_s10 = scalar_lea.sflag [#allocation3], %s997_s25 }
 0x2f6   : > { %p1095_p2 = pnand %p1098_p1, %p1297_p6 }
 0x2f8   : > { %1184 = dma.done.wait (!%p1095_p2), %s998_s10, 256  }
 0x2f9   : > { %1186 = vsyncadd (!%p1095_p2), %s998_s10, 4294967040  ;;  %p18_p3 = scmp.ge.s32.totalorder %s1280_s11, 4   ;;  %s1752_s27 = smov %s1193_s28 }
 0x2fa   : > { %s1753_s28 = smov %s1197_s29  ;;  %s1754_s29 = smov %s1291_s14 }
 0x2fb   : > { %s1755_s30 = smov %s1280_s11  ;;  %20 = sbr.rel (!%p18_p3) target bundleno = 3 (0x3), region = 98 }
 0x302   :  { %1003 = vsyncpa [#allocation3], 1 }
 0x303   :  { %1005 = vsyncpa [#allocation3 + $0x1], 1 }

</bundles_post_ra>
